<compile_context>
chip_gen: v5e
topology: v5e:2x2
jax: 0.10.0
libtpu: 0.0.40
codegen_flags: <defaults>
</compile_context>

<pallas_src>
import jax
import jax.numpy as jnp
from jax.experimental import pallas as pl
from jax.experimental.pallas import tpu as pltpu

_LANE = 128


def _round_up(n, m):
    return ((n + m - 1) // m) * m


def mlp_kernel(x_ref, w1_ref, b1_ref, w2_ref, b2_ref, out_ref):
    x = x_ref[...]                       # (TB, F)   f32
    w1 = w1_ref[...]                     # (F, Hp)   f32, Hp = 128-padded hidden
    n_feature = x.shape[1]

    # ---- Layer 1 on the VPU: outer-product accumulation over the tiny K axis ----
    # h[b, j] = relu(sum_k x[b, k] * w1[k, j] + b1[j]); bias folded into first term.
    acc = x[:, 0:1] * w1[0:1, :] + b1_ref[...]          # (TB,1)*(1,Hp)+(1,Hp)
    for k in range(1, n_feature):                        # statically unrolled (F = 2)
        acc = acc + x[:, k : k + 1] * w1[k : k + 1, :]
    h = jnp.maximum(acc, 0.0)                            # padded lanes stay exactly 0

    # ---- Layer 2 on the MXU: (TB,128) @ (128,O) -> narrow (TB,O) result ----
    o = jnp.dot(h, w2_ref[...], preferred_element_type=jnp.float32)
    o = o + b2_ref[...]                                  # (TB,O) + (1,O)
    out_ref[...] = o.astype(out_ref.dtype)               # narrow store: only real cols


def prepare_params(w1, b1, w2, b2):
    """Pad params once at init time (static shapes).
    w1: (F, H); b1: (H,) or (1, H); w2: (H, O); b2: (O,) or (1, O).
    Returns (w1p (F,Hp), b1p (1,Hp), w2p (Hp,O), b2p (1,O)) with Hp = 128-padded H."""
    F, H = w1.shape
    O = w2.shape[1]
    Hp = _round_up(H, _LANE)

    w1p = jnp.zeros((F, Hp), jnp.float32).at[:, :H].set(w1.astype(jnp.float32))
    b1p = jnp.zeros((1, Hp), jnp.float32).at[:, :H].set(
        jnp.reshape(b1, (1, H)).astype(jnp.float32))
    w2p = jnp.zeros((Hp, O), jnp.float32).at[:H, :].set(w2.astype(jnp.float32))
    b2p = jnp.reshape(b2, (1, O)).astype(jnp.float32)
    return w1p, b1p, w2p, b2p


def net_two_class_forward(x, w1p, b1p, w2p, b2p, *, n_hidden=6, block_rows=4096):
    """x: (B, n_feature) -> (B, n_output) float32.  Params from prepare_params()."""
    B, F = x.shape
    Hp = w1p.shape[1]
    O = w2p.shape[1]

    # Batch tiling:
    #  * B <= block_rows: split into 2 tiles so the "parallel" axis can use both
    #    TensorCores on v7x (free ~2x there, harmless elsewhere).
    #  * larger batches stream in block_rows-row tiles.
    if B <= block_rows:
        TB = _round_up((B + 1) // 2, 8)
        Bp = 2 * TB
    else:
        TB = block_rows
        Bp = _round_up(B, TB)

    xp = x.astype(jnp.float32)
    if Bp != B:
        xp = jnp.pad(xp, ((0, Bp - B), (0, 0)))

    grid = (Bp // TB,)
    f32 = 4
    cost = pl.CostEstimate(                       # real (unpadded) work
        flops=2 * B * (F * n_hidden + n_hidden * O),
        transcendentals=0,
        bytes_accessed=(B * F + F * n_hidden + n_hidden
                        + n_hidden * O + O + B * O) * f32,
    )

    out = pl.pallas_call(
        mlp_kernel,
        out_shape=jax.ShapeDtypeStruct((Bp, O), jnp.float32),
        grid_spec=pltpu.PrefetchScalarGridSpec(
            num_scalar_prefetch=0,
            grid=grid,
            in_specs=[
                pl.BlockSpec((TB, F), lambda i: (i, 0)),    # x: streamed over batch
                pl.BlockSpec((F, Hp), lambda i: (0, 0)),    # weights/biases resident
                pl.BlockSpec((1, Hp), lambda i: (0, 0)),
                pl.BlockSpec((Hp, O), lambda i: (0, 0)),
                pl.BlockSpec((1, O), lambda i: (0, 0)),
            ],
            out_specs=pl.BlockSpec((TB, O), lambda i: (i, 0)),  # narrow: only real cols
        ),
        compiler_params=pltpu.CompilerParams(
            dimension_semantics=("parallel",),       # rows independent -> megacore
            vmem_limit_bytes=32 * 1024 * 1024,       # headroom for TB=4096 on v5e
        ),
        cost_estimate=cost,
    )(xp, w1p, b1p, w2p, b2p)

    return out[:B, :]


def init_params(key, n_feature=2, n_hidden=6, n_output=2):
    # Deterministic init mimicking nn.Linear's uniform(-1/sqrt(fan_in), 1/sqrt(fan_in)).
    k1, k2, k3, k4 = jax.random.split(key, 4)
    lim1 = 1.0 / jnp.sqrt(jnp.float32(n_feature))
    lim2 = 1.0 / jnp.sqrt(jnp.float32(n_hidden))
    w1 = jax.random.uniform(k1, (n_feature, n_hidden), jnp.float32, -lim1, lim1)
    b1 = jax.random.uniform(k2, (1, n_hidden), jnp.float32, -lim1, lim1)
    w2 = jax.random.uniform(k3, (n_hidden, n_output), jnp.float32, -lim2, lim2)
    b2 = jax.random.uniform(k4, (1, n_output), jnp.float32, -lim2, lim2)
    return w1, b1, w2, b2


def _reference(x, w1, b1, w2, b2):
    return jnp.maximum(x @ w1 + b1, 0.0) @ w2 + b2


if __name__ == "__main__":
    key = jax.random.PRNGKey(0)
    k_x, k_p, k_x2 = jax.random.split(key, 3)

    n_feature, n_hidden, n_output = 2, 6, 2
    w1, b1, w2, b2 = init_params(k_p, n_feature, n_hidden, n_output)
    params = prepare_params(w1, b1, w2, b2)     # pad once at init, not per call

    # --- small batch (module-default scale): 2-tile grid (v7x both-TC path) ---
    batch = 8
    x = jax.random.normal(k_x, (batch, n_feature), jnp.float32)
    out = net_two_class_forward(x, *params, n_hidden=n_hidden)
    out = jax.block_until_ready(out)
    ref = _reference(x, w1, b1, w2, b2)
    assert out.shape == (batch, n_output)
    assert jnp.allclose(out, ref, atol=1e-5, rtol=1e-5)

    # --- larger, non-divisible batch: exercises batch padding + tiling ---
    big_batch = 2050
    xb = jax.random.normal(k_x2, (big_batch, n_feature), jnp.float32)
    out_b = net_two_class_forward(xb, *params, n_hidden=n_hidden)
    out_b = jax.block_until_ready(out_b)
    ref_b = _reference(xb, w1, b1, w2, b2)
    assert out_b.shape == (big_batch, n_output)
    assert jnp.allclose(out_b, ref_b, atol=1e-5, rtol=1e-5)

    print("KERNEL_OK")
</pallas_src>

<mosaic_0001>
module attributes {stable_mosaic.version = 11 : i64} {
  func.func @mlp_kernel(%arg0: i32, %arg1: memref<8x2xf32, #tpu.memory_space<vmem>>, %arg2: memref<2x128xf32, #tpu.memory_space<vmem>>, %arg3: memref<1x128xf32, #tpu.memory_space<vmem>>, %arg4: memref<128x2xf32, #tpu.memory_space<vmem>>, %arg5: memref<1x2xf32, #tpu.memory_space<vmem>>, %arg6: memref<8x2xf32, #tpu.memory_space<vmem>>) attributes {dimension_semantics = [#tpu.dimension_semantics<parallel>], iteration_bounds = array<i64: 2>, scalar_prefetch = 0 : i64, scratch_operands = 0 : i64, tpu.core_type = #tpu.core_type<tc>, window_params = [{transform_indices = @transform_0, window_bounds = array<i64: 8, 2>}, {pipeline_mode = #tpu.pipeline_mode<synchronous>, transform_indices = @transform_1, window_bounds = array<i64: 2, 128>}, {pipeline_mode = #tpu.pipeline_mode<synchronous>, transform_indices = @transform_2, window_bounds = array<i64: 1, 128>}, {pipeline_mode = #tpu.pipeline_mode<synchronous>, transform_indices = @transform_3, window_bounds = array<i64: 128, 2>}, {pipeline_mode = #tpu.pipeline_mode<synchronous>, transform_indices = @transform_4, window_bounds = array<i64: 1, 2>}, {transform_indices = @transform_5, window_bounds = array<i64: 8, 2>}]} {
    %c0 = arith.constant 0 : index
    %c0_0 = arith.constant 0 : index
    %0 = vector.load %arg1[%c0, %c0_0] : memref<8x2xf32, #tpu.memory_space<vmem>>, vector<8x2xf32>
    %c0_1 = arith.constant 0 : index
    %c0_2 = arith.constant 0 : index
    %1 = vector.load %arg2[%c0_1, %c0_2] : memref<2x128xf32, #tpu.memory_space<vmem>>, vector<2x128xf32>
    %2 = vector.extract_strided_slice %0 {offsets = [0, 0], sizes = [8, 1], strides = [1, 1]} : vector<8x2xf32> to vector<8x1xf32>
    %3 = vector.extract_strided_slice %1 {offsets = [0, 0], sizes = [1, 128], strides = [1, 1]} : vector<2x128xf32> to vector<1x128xf32>
    %4 = vector.broadcast %2 : vector<8x1xf32> to vector<8x128xf32>
    %5 = vector.broadcast %3 : vector<1x128xf32> to vector<8x128xf32>
    %6 = arith.mulf %4, %5 : vector<8x128xf32>
    %c0_3 = arith.constant 0 : index
    %c0_4 = arith.constant 0 : index
    %7 = vector.load %arg3[%c0_3, %c0_4] : memref<1x128xf32, #tpu.memory_space<vmem>>, vector<1x128xf32>
    %8 = vector.broadcast %7 : vector<1x128xf32> to vector<8x128xf32>
    %9 = arith.addf %6, %8 : vector<8x128xf32>
    %10 = vector.extract_strided_slice %0 {offsets = [0, 1], sizes = [8, 1], strides = [1, 1]} : vector<8x2xf32> to vector<8x1xf32>
    %11 = vector.extract_strided_slice %1 {offsets = [1, 0], sizes = [1, 128], strides = [1, 1]} : vector<2x128xf32> to vector<1x128xf32>
    %12 = vector.broadcast %10 : vector<8x1xf32> to vector<8x128xf32>
    %13 = vector.broadcast %11 : vector<1x128xf32> to vector<8x128xf32>
    %14 = arith.mulf %12, %13 : vector<8x128xf32>
    %15 = arith.addf %9, %14 : vector<8x128xf32>
    %cst = arith.constant 0.000000e+00 : f32
    %16 = vector.broadcast %cst : f32 to vector<8x128xf32>
    %17 = arith.maximumf %15, %16 : vector<8x128xf32>
    %c0_5 = arith.constant 0 : index
    %c0_6 = arith.constant 0 : index
    %18 = vector.load %arg4[%c0_5, %c0_6] : memref<128x2xf32, #tpu.memory_space<vmem>>, vector<128x2xf32>
    %cst_7 = arith.constant dense<0.000000e+00> : vector<8x2xf32>
    %19 = tpu.matmul %17, %18, %cst_7 {dimension_numbers = #tpu.dot_dimension_numbers<[1], [0], [0], [1], [0, 0, 1, 1], [], []>} : vector<8x128xf32>, vector<128x2xf32>, vector<8x2xf32> -> vector<8x2xf32>
    %c0_8 = arith.constant 0 : index
    %c0_9 = arith.constant 0 : index
    %20 = vector.load %arg5[%c0_8, %c0_9] : memref<1x2xf32, #tpu.memory_space<vmem>>, vector<1x2xf32>
    %21 = vector.broadcast %20 : vector<1x2xf32> to vector<8x2xf32>
    %22 = arith.addf %19, %21 : vector<8x2xf32>
    %c0_10 = arith.constant 0 : index
    %c0_11 = arith.constant 0 : index
    %23 = vector.load %arg6[%c0_10, %c0_11] : memref<8x2xf32, #tpu.memory_space<vmem>>, vector<8x2xf32>
    tpu.vector_store %arg6[%c0_10, %c0_11], %22 {strides = array<i32>} : memref<8x2xf32, #tpu.memory_space<vmem>>, vector<8x2xf32>,
    return
  }
  func.func @transform_0(%arg0: i32) -> (i32, i32) {
    %c0_i32 = arith.constant 0 : i32
    %c0_i32_0 = arith.constant 0 : i32
    return %arg0, %c0_i32 : i32, i32
  }
  func.func @transform_1(%arg0: i32) -> (i32, i32) {
    %c0_i32 = arith.constant 0 : i32
    %c0_i32_0 = arith.constant 0 : i32
    %c0_i32_1 = arith.constant 0 : i32
    return %c0_i32, %c0_i32_0 : i32, i32
  }
  func.func @transform_2(%arg0: i32) -> (i32, i32) {
    %c0_i32 = arith.constant 0 : i32
    %c0_i32_0 = arith.constant 0 : i32
    %c0_i32_1 = arith.constant 0 : i32
    return %c0_i32, %c0_i32_0 : i32, i32
  }
  func.func @transform_3(%arg0: i32) -> (i32, i32) {
    %c0_i32 = arith.constant 0 : i32
    %c0_i32_0 = arith.constant 0 : i32
    %c0_i32_1 = arith.constant 0 : i32
    return %c0_i32, %c0_i32_0 : i32, i32
  }
  func.func @transform_4(%arg0: i32) -> (i32, i32) {
    %c0_i32 = arith.constant 0 : i32
    %c0_i32_0 = arith.constant 0 : i32
    %c0_i32_1 = arith.constant 0 : i32
    return %c0_i32, %c0_i32_0 : i32, i32
  }
  func.func @transform_5(%arg0: i32) -> (i32, i32) {
    %c0_i32 = arith.constant 0 : i32
    %c0_i32_0 = arith.constant 0 : i32
    return %arg0, %c0_i32 : i32, i32
  }
}

</mosaic_0001>

<bundles_post_ra>
// kernel: tpu_custom_call.1
= control target key start
LH: loop header
LB: loop body
LE: loop exit
PB: predicated region body
PF: predicated region fallthrough
CT: control target
= control target key end

     0   :  { %s400_s18 = smov 0   ;;  %s481_s0 = inlined_call_operand.vmem [shape: f32[16,2], index: 0, kind: input, shape index: {}]   ;;  %s482_s1 = inlined_call_operand.vmem [shape: f32[2,128], index: 1, kind: input, shape index: {}]   ;;  %s483_s2 = inlined_call_operand.vmem [shape: f32[1,128], index: 2, kind: input, shape index: {}]   ;;  %s484_s3 = inlined_call_operand.vmem [shape: f32[128,2], index: 3, kind: input, shape index: {}]   ;;  %s485_s4 = inlined_call_operand.vmem [shape: f32[1,2], index: 4, kind: input, shape index: {}]   ;;  %s486_s5 = inlined_call_operand.vmem [shape: f32[16,2], index: 5, kind: output, shape index: {}]  }
   0x1 LB: > { %s337_s19 = sadd.s32 4294967295, %s366_s18   ;;  %p341_p0 = scmp.ge.s32.totalorder %s366_s18, 1  ;;  %s366_s18 = sphi %s400_s18, %s15_s18  }
   0x2   : > { %p186_p1 = scmp.lt.s32.totalorder %s366_s18, 3 }
   0x4   : > { %p187_p2 = pnand %p341_p0, %p186_p1 }
   0x5   : > { %p212_p3 = scmp.lt.s32.totalorder (!%p187_p2), %s337_s19, 1 }
   0x6   : > { %190 = sbr.rel (%p187_p2) target bundleno = 274 (0x112), region = 40 }
   0xb   : > { %v257_v0 = vld [vmem:[%s484_s3 + $0x78] sm:$0xff]  ;;  %v256_v1 = vld [vmem:[%s484_s3 + $0x70] sm:$0xff]  ;;  %v368_v2 = vmov 0   ;;  %s488_s19 = smov (!%p212_p3, %s337_s19), 1  ;;  %v255_v3 = vld [vmem:[%s484_s3 + $0x68] sm:$0xff]  ;;  %v369_v10 = vmov 1  }
   0xc   : > { %356 = vset.pattern.permute.xlu0 %v368_v2  ;;  %262 = vmatpush.msra.mxu0 %v257_v0  ;;  %s342_s26 = sshll.u32 %s488_s19, 3  ;;  %v254_v4 = vld [vmem:[%s484_s3 + $0x60] sm:$0xff]  ;;  %v253_v6 = vld [vmem:[%s484_s3 + $0x58] sm:$0xff]  ;;  %v252_v7 = vld [vmem:[%s484_s3 + $0x50] sm:$0xff]  ;;  %vm282_vm0 = vcmask 15360  }
   0xd   : > { %s215_s6 = scalar_lea.vmem %s481_s0, %s342_s26  ;;  %v251_v8 = vld [vmem:[%s484_s3 + $0x48] sm:$0xff]  ;;  %v250_v9 = vld [vmem:[%s484_s3 + $0x40] sm:$0xff]  ;;  %v249_v11 = vld [vmem:[%s484_s3 + $0x38] sm:$0xff]  ;;  %s219_s17 = scalar_lea.vmem %s486_s5, %s342_s26 }
   0xe   : > { %263 = vmatpush.msra.mxu0 %v256_v1  ;;  %v220_v5 = vld [vmem:[%s215_s6] sm:$0xff]  ;;  %v248_v12 = vld [vmem:[%s484_s3 + $0x30] sm:$0xff]  ;;  %v247_v13 = vld [vmem:[%s484_s3 + $0x28] sm:$0xff] }
   0xf   : > { %224 = vperm.xlu0 %356, %v220_v5   ;;  %v246_v14 = vld [vmem:[%s484_s3 + $0x20] sm:$0xff]  ;;  %v245_v15 = vld [vmem:[%s484_s3 + $0x18] sm:$0xff]  ;;  %v244_v16 = vld [vmem:[%s484_s3 + $0x10] sm:$0xff] }
  0x10   : > { %264 = vmatpush.msra.mxu0 %v255_v3  ;;  %v243_v17 = vld [vmem:[%s484_s3 + $0x8] sm:$0xff]  ;;  %v242_v18 = vld [vmem:[%s484_s3] sm:$0xff] }
  0x11   : > { %v221_v19 = vld [vmem:[%s482_s1] sm:$0x3] }
  0x12   : > { %265 = vmatpush.msra.mxu0 %v254_v4  ;;  %v227_v21 = vperm.slane %v221_v19, 0  ;;  %v358_v22 = vld [vmem:[%s483_s2] ss:$0 sm:$0xff]  ;;  %v238_v24 = vperm.slane %v221_v19, 1 }
  0x13   : > { %v359_v30 = vld [vmem:[%s485_s4] ss:$0 sm:$0xff] }
  0x14   : > { %266 = vmatpush.msra.mxu0 %v253_v6 }
  0x16   : > { %267 = vmatpush.msra.mxu0 %v252_v7 }
  0x17   : > { %357 = vset.pattern.permute.xlu0 %v369_v10 }
  0x18   : > { %268 = vmatpush.msra.mxu0 %v251_v8  ;;  %235 = vperm.xlu0 %357, %v220_v5  }
  0x1a   : > { %269 = vmatpush.msra.mxu0 %v250_v9 }
  0x1c   : > { %270 = vmatpush.msra.mxu0 %v249_v11 }
  0x1e   : > { %271 = vmatpush.msra.mxu0 %v248_v12 }
  0x20   : > { %272 = vmatpush.msra.mxu0 %v247_v13 }
  0x22   : > { %273 = vmatpush.msra.mxu0 %v246_v14 }
  0x24   : > { %274 = vmatpush.msra.mxu0 %v245_v15 }
  0x26   : > { %275 = vmatpush.msra.mxu0 %v244_v16 }
  0x28   : > { %276 = vmatpush.msra.mxu0 %v243_v17 }
  0x2a   : > { %277 = vmatpush.msra.mxu0 %v242_v18 }
  0x81   : > { %v225_v20 = vpop.permute.xlu0 %224 }
  0x82   : > { %v228_v23 = vmul.f32 %v227_v21, %v225_v20 }
  0x84   : > { %v233_v26 = vadd.f32 %v358_v22, %v228_v23 }
  0x8a   : > { %v236_v25 = vpop.permute.xlu0 %235 }
  0x8b   : > { %v239_v27 = vmul.f32 %v238_v24, %v236_v25 }
  0x8d   : > { %v240_v28 = vadd.f32 %v239_v27, %v233_v26 }
  0x8f   : > { %v241_v29 = vmax.f32 %v240_v28, 0.0 }
  0x91   : > { %278 = vmatmul.f32.vlgmr.msra.gmra.mxu0 %v241_v29 }
 0x10e   : > { %v279_v31 = vpop.f32.mrf.mxu0 }
 0x10f   : > { %v280_v32 = vadd.f32 %v359_v30, %v279_v31 }
 0x111   : > { %283 = vst.msk [vmem:[%s219_s17] sm:$0xff] %vm282_vm0, %v280_v32 }
 0x112 PF: > { %s15_s18 = sadd.s32 1, %s366_s18  }
 0x113   : > { %p12_p4 = scmp.ge.s32.totalorder %s15_s18, 4  }
 0x115   :  { %14 = sbr.rel (!%p12_p4) target bundleno = 1 (0x1), region = 70 }

</bundles_post_ra>
